<compile_context>
chip_gen: v6e
topology: v6e:2x2x1
jax: 0.10.0
libtpu: 0.0.40
codegen_flags: <defaults>
</compile_context>

<pallas_src>
import functools

import numpy as np
import jax
import jax.numpy as jnp
from jax.experimental import pallas as pl
from jax.experimental.pallas import tpu as pltpu


_LANE = 128           # TPU lane width
_MAX_TILE = 16384     # max flattened-HW lanes per grid step (multiple of 128)


def _base_coords(n, align_corners=False):
    """Matches torch affine_grid's linspace_from_neg_one."""
    if n <= 1:
        return np.zeros((max(n, 0),), dtype=np.float32)
    r = np.linspace(-1.0, 1.0, n, dtype=np.float64)
    if not align_corners:
        r = r * (n - 1) / n
    return r.astype(np.float32)


def _affine_grid_kernel(theta_ref, xy_ref, out_ref):
    """theta_ref: VMEM (2B, 3) f32; row r = 2*b + c holds theta[b, c, :] = (ax, ay, bias)
    xy_ref:    VMEM (2, T)  f32; row 0 = x coord, row 1 = y coord of this tile
    out_ref:   VMEM (2B, T) f32; row r = warped coordinate c of batch b
    """
    rows, t = out_ref.shape
    tm = theta_ref[...]                                    # (2B, 3), single vreg load
    x = jnp.broadcast_to(xy_ref[0:1, :], (rows, t))        # sublane broadcast
    y = jnp.broadcast_to(xy_ref[1:2, :], (rows, t))        # sublane broadcast
    ax = tm[:, 0:1]                                        # (2B, 1) -> lane broadcast
    ay = tm[:, 1:2]
    bias = tm[:, 2:3]
    # Pure VPU FMAs; direct full-block store (no concatenate / XLU shuffle).
    out_ref[...] = ax * x + ay * y + bias


def affine_grid_gen(theta, out_h=16, out_w=16, align_corners=False):
    """Pallas equivalent of AffineGridGen(out_h, out_w).forward(theta).

    theta: (B, 2, 3) float32 (anything view-able to (-1, 2, 3), like PyTorch).
    returns: (B, out_h, out_w, 2) float32 sampling grid (last dim = (x, y)).
    """
    theta = jnp.asarray(theta, dtype=jnp.float32)
    if theta.ndim != 3 or theta.shape[1:] != (2, 3):
        theta = theta.reshape(-1, 2, 3)
    b = theta.shape[0]
    theta_mat = theta.reshape(2 * b, 3)                    # rows: b-major, (x,y) minor

    # Host-precomputed coordinate basis (compile-time constant w.r.t. theta).
    hw = out_h * out_w
    xs = _base_coords(out_w, align_corners)                # (W,)
    ys = _base_coords(out_h, align_corners)                # (H,)
    gx, gy = np.meshgrid(xs, ys)                           # (H, W) each, 'xy' indexing
    xy = np.stack([gx.reshape(-1), gy.reshape(-1)], axis=0).astype(np.float32)  # (2, HW)

    # Lane-dense padding + HW tiling (single grid step for small outputs).
    hw_pad = ((hw + _LANE - 1) // _LANE) * _LANE
    tile = min(hw_pad, _MAX_TILE)
    hw_pad = ((hw_pad + tile - 1) // tile) * tile
    n_tiles = hw_pad // tile
    if hw_pad != hw:
        xy = np.concatenate(
            [xy, np.zeros((2, hw_pad - hw), dtype=np.float32)], axis=1)
    xy = jnp.asarray(xy)

    out = pl.pallas_call(
        _affine_grid_kernel,
        out_shape=jax.ShapeDtypeStruct((2 * b, hw_pad), jnp.float32),
        grid_spec=pltpu.PrefetchScalarGridSpec(
            num_scalar_prefetch=0,
            grid=(n_tiles,),
            in_specs=[
                pl.BlockSpec((2 * b, 3), lambda i: (0, 0)),     # theta (resident)
                pl.BlockSpec((2, tile), lambda i: (0, i)),      # fused x/y basis tile
            ],
            out_specs=pl.BlockSpec((2 * b, tile), lambda i: (0, i)),
        ),
        compiler_params=pltpu.CompilerParams(
            dimension_semantics=("parallel",),     # shards HW tiles over v7x's 2 TCs
        ),
    )(theta_mat, xy)

    # (2B, HW_pad) -> slice padding -> (B, 2, H, W) -> (B, H, W, 2)
    out = out[:, :hw].reshape(b, 2, out_h, out_w)
    return jnp.transpose(out, (0, 2, 3, 1))


def affine_grid_reference(theta, out_h, out_w, align_corners=False):
    """Pure-JAX reference mirroring F.affine_grid (align_corners=False)."""
    theta = jnp.asarray(theta, dtype=jnp.float32)
    if theta.ndim != 3 or theta.shape[1:] != (2, 3):
        theta = theta.reshape(-1, 2, 3)
    xs = jnp.asarray(_base_coords(out_w, align_corners))
    ys = jnp.asarray(_base_coords(out_h, align_corners))
    gx, gy = jnp.meshgrid(xs, ys)                          # (H, W)
    base = jnp.stack([gx, gy, jnp.ones_like(gx)], axis=-1)  # (H, W, 3)
    return jnp.einsum('hwk,bck->bhwc', base, theta)        # (B, H, W, 2)


if __name__ == "__main__":
    # Small shapes consistent with the module: batch=2, out_h=out_w=16.
    B, OUT_H, OUT_W = 2, 16, 16

    key = jax.random.PRNGKey(0)
    theta = 0.1 * jax.random.normal(key, (B, 2, 3), dtype=jnp.float32)
    # Bias toward identity, as a typical spatial-transformer init would.
    theta = theta.at[:, 0, 0].add(1.0)
    theta = theta.at[:, 1, 1].add(1.0)

    fn = jax.jit(functools.partial(affine_grid_gen, out_h=OUT_H, out_w=OUT_W))
    grid = jax.block_until_ready(fn(theta))

    ref = affine_grid_reference(theta, OUT_H, OUT_W)
    assert grid.shape == (B, OUT_H, OUT_W, 2), grid.shape
    np.testing.assert_allclose(np.asarray(grid), np.asarray(ref),
                               rtol=1e-5, atol=1e-5)
    print("KERNEL_OK")
</pallas_src>

<mosaic_0001>
module attributes {stable_mosaic.version = 11 : i64} {
  func.func @_affine_grid_kernel(%arg0: i32, %arg1: memref<4x3xf32, #tpu.memory_space<vmem>>, %arg2: memref<2x256xf32, #tpu.memory_space<vmem>>, %arg3: memref<4x256xf32, #tpu.memory_space<vmem>>) attributes {dimension_semantics = [#tpu.dimension_semantics<parallel>], iteration_bounds = array<i64: 1>, scalar_prefetch = 0 : i64, scratch_operands = 0 : i64, tpu.core_type = #tpu.core_type<tc>, window_params = [{pipeline_mode = #tpu.pipeline_mode<synchronous>, transform_indices = @transform_0, window_bounds = array<i64: 4, 3>}, {transform_indices = @transform_1, window_bounds = array<i64: 2, 256>}, {transform_indices = @transform_2, window_bounds = array<i64: 4, 256>}]} {
    %c0 = arith.constant 0 : index
    %c0_0 = arith.constant 0 : index
    %0 = vector.load %arg1[%c0, %c0_0] : memref<4x3xf32, #tpu.memory_space<vmem>>, vector<4x3xf32>
    %c0_1 = arith.constant 0 : index
    %c0_2 = arith.constant 0 : index
    %1 = vector.load %arg2[%c0_1, %c0_2] : memref<2x256xf32, #tpu.memory_space<vmem>>, vector<1x256xf32>
    %2 = vector.shape_cast %1 : vector<1x256xf32> to vector<1x256xf32>
    %3 = vector.broadcast %2 : vector<1x256xf32> to vector<4x256xf32>
    %c1 = arith.constant 1 : index
    %c0_3 = arith.constant 0 : index
    %4 = vector.load %arg2[%c1, %c0_3] : memref<2x256xf32, #tpu.memory_space<vmem>>, vector<1x256xf32>
    %5 = vector.shape_cast %4 : vector<1x256xf32> to vector<1x256xf32>
    %6 = vector.broadcast %5 : vector<1x256xf32> to vector<4x256xf32>
    %7 = vector.extract_strided_slice %0 {offsets = [0, 0], sizes = [4, 1], strides = [1, 1]} : vector<4x3xf32> to vector<4x1xf32>
    %8 = vector.extract_strided_slice %0 {offsets = [0, 1], sizes = [4, 1], strides = [1, 1]} : vector<4x3xf32> to vector<4x1xf32>
    %9 = vector.extract_strided_slice %0 {offsets = [0, 2], sizes = [4, 1], strides = [1, 1]} : vector<4x3xf32> to vector<4x1xf32>
    %10 = vector.broadcast %7 : vector<4x1xf32> to vector<4x256xf32>
    %11 = arith.mulf %10, %3 : vector<4x256xf32>
    %12 = vector.broadcast %8 : vector<4x1xf32> to vector<4x256xf32>
    %13 = arith.mulf %12, %6 : vector<4x256xf32>
    %14 = arith.addf %11, %13 : vector<4x256xf32>
    %15 = vector.broadcast %9 : vector<4x1xf32> to vector<4x256xf32>
    %16 = arith.addf %14, %15 : vector<4x256xf32>
    %c0_4 = arith.constant 0 : index
    %c0_5 = arith.constant 0 : index
    %17 = vector.load %arg3[%c0_4, %c0_5] : memref<4x256xf32, #tpu.memory_space<vmem>>, vector<4x256xf32>
    tpu.vector_store %arg3[%c0_4, %c0_5], %16 {strides = array<i32>} : memref<4x256xf32, #tpu.memory_space<vmem>>, vector<4x256xf32>,
    return
  }
  func.func @transform_0(%arg0: i32) -> (i32, i32) {
    %c0_i32 = arith.constant 0 : i32
    %c0_i32_0 = arith.constant 0 : i32
    %c0_i32_1 = arith.constant 0 : i32
    return %c0_i32, %c0_i32_0 : i32, i32
  }
  func.func @transform_1(%arg0: i32) -> (i32, i32) {
    %c0_i32 = arith.constant 0 : i32
    %c0_i32_0 = arith.constant 0 : i32
    return %c0_i32, %arg0 : i32, i32
  }
  func.func @transform_2(%arg0: i32) -> (i32, i32) {
    %c0_i32 = arith.constant 0 : i32
    %c0_i32_0 = arith.constant 0 : i32
    return %c0_i32, %arg0 : i32, i32
  }
}

</mosaic_0001>

<bundles_post_ra>
// kernel: affine_grid_gen.1
= control target key start
LH: loop header
LB: loop body
LE: loop exit
PB: predicated region body
PF: predicated region fallthrough
CT: control target
= control target key end

     0   :  { %7 = vsyncpa [#allocation3], 0  ;;  %s175_s0 = inlined_call_operand.hbm [shape: f32[4,3], index: 0, kind: input, shape index: {}]   ;;  %s176_s1 = inlined_call_operand.hbm [shape: f32[2,256], index: 1, kind: input, shape index: {}]   ;;  %s177_s2 = inlined_call_operand.vmem [shape: f32[4,256], index: 2, kind: output, shape index: {}]  }
   0x1   :  { %8 = vsyncpa [#allocation5], 0  ;;  %s146_s9 = smov [#allocation2]   ;;  %s147_s11 = smov [#allocation4]  }
   0x2   :  { %s15_s10 = sshll.u32 %s146_s9, 4  ;;  %s25_s12 = sshll.u32 %s147_s11, 4  ;;  %s16_s10 = int_to_ptr.vmem [resolvable:$true] %s15_s10  ;;  %s26_s12 = int_to_ptr.vmem [resolvable:$true] %s25_s12 }
   0x3   :  { %s110_s13 = scalar_lea.vmem %s16_s10, 64  ;;  %p115_p1 = scmp.lt.s32.totalorder %s16_s10, %s16_s10 }
   0x4   :  { %p111_p0 = scmp.ne.s32.totalorder %s16_s10, %s110_s13  ;;  %p116_p2 = scmp.lt.s32.totalorder %s110_s13, %s110_s13 }
   0x6   :  { %p117_p3 = por %p116_p2, %p115_p1 }
   0x8   :  { %p118_p4 = pnand %p117_p3, %p111_p0 }
   0xa   :  { %121 = shalt.err (!%p118_p4)
}
   0xb   :  { %18 = dma.hbm_to_vmem [thread:$0]  %s175_s0, 64, %s16_s10, [#allocation3]  }
   0xc   :  { %s130_s16 = scalar_lea.vmem %s26_s12, 64  ;;  %p135_p6 = scmp.lt.s32.totalorder %s26_s12, %s26_s12 }
   0xd   :  { %p131_p5 = scmp.ne.s32.totalorder %s26_s12, %s130_s16  ;;  %p136_p7 = scmp.lt.s32.totalorder %s130_s16, %s130_s16 }
   0xf   :  { %p137_p8 = por %p136_p7, %p135_p6 }
  0x11   :  { %p138_p9 = pnand %p137_p8, %p131_p5 }
  0x13   :  { %141 = shalt.err (!%p138_p9)
}
  0x14   :  { %28 = dma.hbm_to_vmem [thread:$0]  %s176_s1, 64, %s26_s12, [#allocation5]  }
  0x15   :  { %142 = dma.done.wait [#allocation3], 64  }
  0x16   :  { %143 = vsyncadd [#allocation3], 4294967232 }
  0x17   :  { %144 = dma.done.wait [#allocation5], 64  }
  0x18   :  { %145 = vsyncadd [#allocation5], 4294967232  ;;  %v148_v0 = vmov 0   ;;  %v149_v1 = vmov 2   ;;  %v35_v2 = vld [vmem:[#allocation2] sm:$0xf]  ;;  %v38_v4 = vlaneseq }
  0x19   :  { %98 = vset.pattern.permute.xlu0 %v148_v0  ;;  %100 = vset.pattern.permute.xlu1 %v149_v1  ;;  %v150_v3 = vmov 1   ;;  %v36_v8 = vld [vmem:[#allocation4] ss:$2 sm:$0x3] }
  0x1a   :  { %63 = vperm.xlu0 %98, %v35_v2   ;;  %77 = vperm.xlu1 %100, %v35_v2   ;;  %v39_v5 = vshrl.u32 %v38_v4, 7  ;;  %v49_v9 = vld [vmem:[#allocation4 + $0x1] ss:$2 sm:$0x3] }
  0x1c   :  { %v40_v6 = vsub.s32 0, %v39_v5  ;;  %v44_v7 = vsub.s32 1, %v39_v5 }
  0x1e   :  { %99 = vset.pattern.permute.xlu0 %v150_v3  ;;  %v41_v11 = vrot.slane %v36_v8, %v40_v6  ;;  %v45_v12 = vrot.slane %v36_v8, %v44_v7  ;;  %v54_v13 = vrot.slane %v49_v9, %v40_v6  ;;  %v58_v14 = vrot.slane %v49_v9, %v44_v7 }
  0x1f   :  { %69 = vperm.xlu0 %99, %v35_v2  }
  0x23   :  { %101 = vset.pattern.permute.xlu0 %v149_v1 }
  0x95   :  { %v64_v10 = vpop.permute.xlu0 %63  ;;  %v78_v20 = vpop.permute.xlu1 %77 }
  0x96   :  { %v66_v16 = vmul.f32 %v64_v10, %v41_v11  ;;  %v67_v17 = vmul.f32 %v64_v10, %v45_v12 }
  0x9a   :  { %v70_v15 = vpop.permute.xlu0 %69 }
  0x9b   :  { %v72_v18 = vmul.f32 %v70_v15, %v54_v13  ;;  %v73_v19 = vmul.f32 %v70_v15, %v58_v14 }
  0x9d   :  { %v74_v21 = vadd.f32 %v72_v18, %v66_v16  ;;  %v75_v22 = vadd.f32 %v73_v19, %v67_v17 }
  0x9f   :  { %v80_v23 = vadd.f32 %v78_v20, %v74_v21  ;;  %v81_v24 = vadd.f32 %v78_v20, %v75_v22 }
  0xa1   :  { %v84_v25 = vcombine.low %v80_v23, %v81_v24 }
  0xa3   :  { %86 = vst [vmem:[%s177_s2] sm:$0xff] %v84_v25 }
  0xa4   :  { %91 = vsyncpa [#allocation3], 1 }
  0xa5   :  { %92 = vsyncpa [#allocation5], 1 }

</bundles_post_ra>
